<compile_context>
chip_gen: v7x
topology: tpu7x:2x2x1
jax: 0.10.0
libtpu: 0.0.40
codegen_flags: <defaults>
</compile_context>

<pallas_src>
import math

import jax
import jax.numpy as jnp
from jax import lax
from jax.experimental import pallas as pl
from jax.experimental.pallas import tpu as pltpu


def _gelu_exact(x):
    # PyTorch nn.GELU() default = exact erf formulation (computed in f32).
    return 0.5 * x * (1.0 + lax.erf(x * (1.0 / math.sqrt(2.0))))


# ---------------------------------------------------------------------------
# Fused kernel (one grid step per token tile):
#   MLP -> L2 normalize -> weight-normed projection over the FULL output dim.
# Weights / v are VMEM-resident (constant index map, single-buffered).
# ---------------------------------------------------------------------------
def ibot_head_kernel(x_ref, w1_ref, b1_ref, w2_ref, b2_ref, w3_ref, b3_ref,
                     v_ref, o_ref):
    # 3-layer MLP: bf16 MXU operands, f32 accumulation / bias / GELU.
    h = jnp.dot(x_ref[...], w1_ref[...], preferred_element_type=jnp.float32)
    h = _gelu_exact(h + b1_ref[...])
    h = jnp.dot(h.astype(w2_ref.dtype), w2_ref[...],
                preferred_element_type=jnp.float32)
    h = _gelu_exact(h + b2_ref[...])
    z = jnp.dot(h.astype(w3_ref.dtype), w3_ref[...],
                preferred_element_type=jnp.float32) + b3_ref[...]
    # F.normalize(z, dim=-1, p=2): z / max(||z||, 1e-12), done in f32 via
    # rsqrt(max(||z||^2, 1e-24)) (EUP rsqrt; mathematically equivalent clamp).
    inv = lax.rsqrt(jnp.maximum(jnp.sum(z * z, axis=-1, keepdims=True), 1e-24))
    zb = (z * inv).astype(v_ref.dtype)
    # Weight-normed projection; the g/||v|| column scale is already folded
    # into v_ref in the wrapper, so this is a clean matmul -> cast -> store.
    o_ref[...] = jnp.dot(zb, v_ref[...],
                         preferred_element_type=jnp.float32).astype(o_ref.dtype)


# ---------------------------------------------------------------------------
# Generation-aware VMEM budgeting & token-tile selection.
# ---------------------------------------------------------------------------
def _round_up(x, m):
    return ((x + m - 1) // m) * m


def _vmem_budget_bytes():
    try:
        cap = int(pltpu.get_tpu_info().vmem_capacity_bytes)
    except Exception:
        cap = 64 * 1024 * 1024  # conservative (v7x-sized) fallback
    # ~72% of physical VMEM, never above 100 MiB:
    #   v7x (64 MiB)  -> ~46 MiB,   v5e/v6e (128 MiB) -> ~92 MiB.
    return min(int(cap * 0.72), 100 * 1024 * 1024)


def _estimate_vmem_bytes(tm, Din, Dh, Db, Dout, out_bytes):
    # Single-buffered resident bf16 weights (+ f32 biases).
    resident = 2 * (Din * Dh + Dh * Dh + Dh * Db + Db * Dout) + 4 * (2 * Dh + Db)
    # Double-buffered streaming x tile (bf16) and output tile.
    streams = 2 * tm * Din * 2 + 2 * tm * Dout * out_bytes
    # In-kernel intermediates: f32 h tensors + bf16 casts + z.
    interm = tm * (2 * Dh * 4 + 2 * Dh * 2 + Db * 4 + Db * 2)
    if out_bytes < 4:  # f32 matmul result materialized before the narrow cast
        interm += tm * Dout * 4
    return resident + streams + interm


def _choose_tm(T, Din, Dh, Db, Dout, out_bytes, budget):
    T8 = _round_up(max(T, 8), 8)
    for tm in (256, 128, 64, 32, 16, 8):
        if tm > T8:
            continue
        if _estimate_vmem_bytes(tm, Din, Dh, Db, Dout, out_bytes) > budget:
            continue
        # Prefer >= 2 token tiles so both v7x TensorCores get work from the
        # "parallel" axis (no effect on single-TC v5e/v6e beyond tiny overhead).
        if T8 >= 2 * tm or tm == 8:
            return tm
    return 8


# ---------------------------------------------------------------------------
# Wrapper around pallas_call.
# ---------------------------------------------------------------------------
def _head_projection(tokens, w1, b1, w2, b2, w3, b3, v_scaled,
                     *, out_dtype=jnp.float32):
    """tokens: (T, Din) bf16 -> (T, Dout) out_dtype."""
    T, Din = tokens.shape
    Dh = w1.shape[1]
    Db = w3.shape[1]
    Dout = v_scaled.shape[1]
    out_bytes = jnp.dtype(out_dtype).itemsize

    budget = _vmem_budget_bytes()
    tm = _choose_tm(T, Din, Dh, Db, Dout, out_bytes, budget)
    T_pad = _round_up(T, tm)
    if T_pad != T:
        # Pad token rows to a multiple of tm (>= 8): keeps every matmul on
        # native (8,128) tiles; padded rows produce zeros and are sliced off.
        tokens = jnp.pad(tokens, ((0, T_pad - T), (0, 0)))
    grid = (T_pad // tm,)

    resident = dict(pipeline_mode=pl.Buffered(1))  # single-buffer residents

    out = pl.pallas_call(
        ibot_head_kernel,
        out_shape=jax.ShapeDtypeStruct((T_pad, Dout), out_dtype),
        grid=grid,
        in_specs=[
            pl.BlockSpec((tm, Din), lambda i: (i, 0)),               # x tile (streams)
            pl.BlockSpec((Din, Dh), lambda i: (0, 0), **resident),   # w1
            pl.BlockSpec((1, Dh),   lambda i: (0, 0), **resident),   # b1
            pl.BlockSpec((Dh, Dh),  lambda i: (0, 0), **resident),   # w2
            pl.BlockSpec((1, Dh),   lambda i: (0, 0), **resident),   # b2
            pl.BlockSpec((Dh, Db),  lambda i: (0, 0), **resident),   # w3
            pl.BlockSpec((1, Db),   lambda i: (0, 0), **resident),   # b3
            pl.BlockSpec((Db, Dout), lambda i: (0, 0), **resident),  # v (resident, scale folded)
        ],
        out_specs=pl.BlockSpec((tm, Dout), lambda i: (i, 0)),
        compiler_params=pltpu.CompilerParams(
            dimension_semantics=("parallel",),
            vmem_limit_bytes=budget,
        ),
    )(tokens, w1, b1, w2, b2, w3, b3, v_scaled)

    return out[:T] if T_pad != T else out


# ---------------------------------------------------------------------------
# Parameter construction (deterministic, synthetic). Shapes match
# iBOTHead.__init__ defaults; MLP weights stored transposed (in, out) in bf16,
# weight-norm v kept in f32 so g/||v|| matches PyTorch weight_norm exactly.
# ---------------------------------------------------------------------------
def init_ibot_head_params(key, in_dim, out_dim, patch_out_dim,
                          hidden_dim, bottleneck_dim):
    ks = jax.random.split(key, 5)

    def tn(k, shape, std=0.02, dtype=jnp.bfloat16):
        # trunc_normal_(std=0.02) approximated by a clipped normal.
        w = jnp.clip(jax.random.normal(k, shape, jnp.float32) * std, -2.0, 2.0)
        return w.astype(dtype)

    return dict(
        # mlp: Linear(in, hidden) -> GELU -> Linear(hidden, hidden) -> GELU
        #      -> Linear(hidden, bottleneck)
        w1=tn(ks[0], (in_dim, hidden_dim)),
        b1=jnp.zeros((1, hidden_dim), jnp.float32),
        w2=tn(ks[1], (hidden_dim, hidden_dim)),
        b2=jnp.zeros((1, hidden_dim), jnp.float32),
        w3=tn(ks[2], (hidden_dim, bottleneck_dim)),
        b3=jnp.zeros((1, bottleneck_dim), jnp.float32),
        # last_layer  : weight_norm(Linear(bottleneck, out_dim, bias=False))
        # last_layer2 : weight_norm(Linear(bottleneck, patch_out_dim, bias=False))
        v1=tn(ks[3], (bottleneck_dim, out_dim), dtype=jnp.float32),
        g1=jnp.ones((1, out_dim), jnp.float32),            # weight_g filled with 1
        v2=tn(ks[4], (bottleneck_dim, patch_out_dim), dtype=jnp.float32),
        g2=jnp.ones((1, patch_out_dim), jnp.float32),
    )


def _fold_weight_norm(v, g):
    # nn.utils.weight_norm(dim=0): W_row = g_row * v_row / ||v_row||.  Stored
    # transposed (in, out) here -> per-column scale.  Norm + scale computed in
    # f32 (matches PyTorch), then the folded operand is cast to bf16 for MXU.
    vf = v.astype(jnp.float32)
    scale = g / jnp.sqrt(jnp.sum(vf * vf, axis=0, keepdims=True))  # (1, Dout)
    return (vf * scale).astype(jnp.bfloat16)


@jax.jit
def ibot_head_forward(x, params):
    """x: (B, N, in_dim) -> (x1: (B, out_dim), x2: (B, N-1, patch_out_dim)).

    2-D inputs follow DINOHead.forward (MLP -> normalize -> last_layer).
    """
    mlp = (params["w1"], params["b1"], params["w2"], params["b2"],
           params["w3"], params["b3"])
    v1 = _fold_weight_norm(params["v1"], params["g1"])

    if x.ndim == 2:
        return _head_projection(x.astype(jnp.bfloat16), *mlp, v1)

    B, N, Din = x.shape
    xb = x.astype(jnp.bfloat16)
    v2 = _fold_weight_norm(params["v2"], params["g2"])

    # CLS head (last_layer) and patch head (last_layer2) are two calls of the
    # same fused kernel on disjoint token sets -> MLP runs exactly once/token.
    x1 = _head_projection(xb[:, 0, :], *mlp, v1)                      # (B, out)
    x2 = _head_projection(xb[:, 1:, :].reshape(B * (N - 1), Din), *mlp, v2)
    return x1, x2.reshape(B, N - 1, -1)


# ---------------------------------------------------------------------------
# Pure-JAX reference. compute_dtype=bf16 mirrors the kernel's MXU operand
# precision (accumulation in f32 everywhere); f32 gives the exact PyTorch math.
# ---------------------------------------------------------------------------
def ibot_head_reference(x, p, compute_dtype=jnp.float32):
    cd = compute_dtype

    def mm(a, w):
        return jnp.dot(a.astype(cd), w.astype(cd),
                       preferred_element_type=jnp.float32)

    def gelu(v):
        return 0.5 * v * (1.0 + lax.erf(v / math.sqrt(2.0)))

    h = gelu(mm(x, p["w1"]) + p["b1"])
    h = gelu(mm(h, p["w2"]) + p["b2"])
    z = mm(h, p["w3"]) + p["b3"]
    z = z / jnp.maximum(jnp.linalg.norm(z, axis=-1, keepdims=True), 1e-12)

    def wn(v, g):
        vf = v.astype(jnp.float32)
        return vf * (g / jnp.sqrt(jnp.sum(vf * vf, axis=0, keepdims=True)))

    x1 = mm(z[:, 0, :], wn(p["v1"], p["g1"]))
    x2 = mm(z[:, 1:, :], wn(p["v2"], p["g2"]))
    return x1, x2


if __name__ == "__main__":
    # Small but lane-aligned (multiples of 128) dims, consistent with iBOTHead
    # (real config: in≈1024, hidden=2048, bottleneck=256, out=patch_out=8192).
    B, N = 2, 9                      # 1 CLS token + 8 patch tokens
    in_dim, hidden_dim, bottleneck_dim = 128, 256, 128
    out_dim, patch_out_dim = 256, 256

    key = jax.random.PRNGKey(0)
    k_x, k_p = jax.random.split(key)
    x = jax.random.normal(k_x, (B, N, in_dim), jnp.float32)
    params = init_ibot_head_params(k_p, in_dim, out_dim, patch_out_dim,
                                   hidden_dim, bottleneck_dim)

    x1, x2 = ibot_head_forward(x, params)
    jax.block_until_ready((x1, x2))
    assert x1.shape == (B, out_dim) and x2.shape == (B, N - 1, patch_out_dim)

    # Tight check vs a reference mirroring the kernel's bf16 operand path.
    r1, r2 = ibot_head_reference(x, params, jnp.bfloat16)
    assert jnp.allclose(x1, r1, atol=5e-3, rtol=5e-3), "x1 mismatch (bf16 ref)"
    assert jnp.allclose(x2, r2, atol=5e-3, rtol=5e-3), "x2 mismatch (bf16 ref)"

    # Loose sanity vs the full-f32 reference (bounds the bf16 approximation).
    f1, f2 = ibot_head_reference(x, params, jnp.float32)
    assert jnp.allclose(x1, f1, atol=2e-2, rtol=1e-1), "x1 drift vs f32 ref"
    assert jnp.allclose(x2, f2, atol=2e-2, rtol=1e-1), "x2 drift vs f32 ref"

    print("KERNEL_OK")
</pallas_src>

<mosaic_0001>
module attributes {stable_mosaic.version = 11 : i64} {
  func.func @ibot_head_kernel(%arg0: i32, %arg1: memref<8x128xbf16, #tpu.memory_space<vmem>>, %arg2: memref<128x256xbf16, #tpu.memory_space<vmem>>, %arg3: memref<1x256xf32, #tpu.memory_space<vmem>>, %arg4: memref<256x256xbf16, #tpu.memory_space<vmem>>, %arg5: memref<1x256xf32, #tpu.memory_space<vmem>>, %arg6: memref<256x128xbf16, #tpu.memory_space<vmem>>, %arg7: memref<1x128xf32, #tpu.memory_space<vmem>>, %arg8: memref<128x256xbf16, #tpu.memory_space<vmem>>, %arg9: memref<8x256xf32, #tpu.memory_space<vmem>>) attributes {dimension_semantics = [#tpu.dimension_semantics<parallel>], iteration_bounds = array<i64: 1>, scalar_prefetch = 0 : i64, scratch_operands = 0 : i64, tpu.core_type = #tpu.core_type<tc>, window_params = [{transform_indices = @transform_0, window_bounds = array<i64: 8, 128>}, {pipeline_mode = #tpu.pipeline_mode<synchronous>, transform_indices = @transform_1, window_bounds = array<i64: 128, 256>}, {pipeline_mode = #tpu.pipeline_mode<synchronous>, transform_indices = @transform_2, window_bounds = array<i64: 1, 256>}, {pipeline_mode = #tpu.pipeline_mode<synchronous>, transform_indices = @transform_3, window_bounds = array<i64: 256, 256>}, {pipeline_mode = #tpu.pipeline_mode<synchronous>, transform_indices = @transform_4, window_bounds = array<i64: 1, 256>}, {pipeline_mode = #tpu.pipeline_mode<synchronous>, transform_indices = @transform_5, window_bounds = array<i64: 256, 128>}, {pipeline_mode = #tpu.pipeline_mode<synchronous>, transform_indices = @transform_6, window_bounds = array<i64: 1, 128>}, {pipeline_mode = #tpu.pipeline_mode<synchronous>, transform_indices = @transform_7, window_bounds = array<i64: 128, 256>}, {transform_indices = @transform_8, window_bounds = array<i64: 8, 256>}]} {
    %c0 = arith.constant 0 : index
    %c0_0 = arith.constant 0 : index
    %0 = vector.load %arg1[%c0, %c0_0] : memref<8x128xbf16, #tpu.memory_space<vmem>>, vector<8x128xbf16>
    %c0_1 = arith.constant 0 : index
    %c0_2 = arith.constant 0 : index
    %1 = vector.load %arg2[%c0_1, %c0_2] : memref<128x256xbf16, #tpu.memory_space<vmem>>, vector<128x256xbf16>
    %cst = arith.constant dense<0.000000e+00> : vector<8x256xf32>
    %2 = tpu.matmul %0, %1, %cst {dimension_numbers = #tpu.dot_dimension_numbers<[1], [0], [0], [1], [0, 0, 1, 1], [], []>} : vector<8x128xbf16>, vector<128x256xbf16>, vector<8x256xf32> -> vector<8x256xf32>
    %c0_3 = arith.constant 0 : index
    %c0_4 = arith.constant 0 : index
    %3 = vector.load %arg3[%c0_3, %c0_4] : memref<1x256xf32, #tpu.memory_space<vmem>>, vector<1x256xf32>
    %4 = vector.broadcast %3 : vector<1x256xf32> to vector<8x256xf32>
    %5 = arith.addf %2, %4 : vector<8x256xf32>
    %cst_5 = arith.constant 5.000000e-01 : f32
    %6 = vector.broadcast %cst_5 : f32 to vector<8x256xf32>
    %7 = arith.mulf %6, %5 : vector<8x256xf32>
    %cst_6 = arith.constant 0.707106769 : f32
    %8 = vector.broadcast %cst_6 : f32 to vector<8x256xf32>
    %9 = arith.mulf %5, %8 : vector<8x256xf32>
    %10 = math.erf %9 : vector<8x256xf32>
    %cst_7 = arith.constant 1.000000e+00 : f32
    %11 = vector.broadcast %cst_7 : f32 to vector<8x256xf32>
    %12 = arith.addf %11, %10 : vector<8x256xf32>
    %13 = arith.mulf %7, %12 : vector<8x256xf32>
    %14 = arith.truncf %13 : vector<8x256xf32> to vector<8x256xbf16>
    %c0_8 = arith.constant 0 : index
    %c0_9 = arith.constant 0 : index
    %15 = vector.load %arg4[%c0_8, %c0_9] : memref<256x256xbf16, #tpu.memory_space<vmem>>, vector<256x256xbf16>
    %cst_10 = arith.constant dense<0.000000e+00> : vector<8x256xf32>
    %16 = tpu.matmul %14, %15, %cst_10 {dimension_numbers = #tpu.dot_dimension_numbers<[1], [0], [0], [1], [0, 0, 1, 1], [], []>} : vector<8x256xbf16>, vector<256x256xbf16>, vector<8x256xf32> -> vector<8x256xf32>
    %c0_11 = arith.constant 0 : index
    %c0_12 = arith.constant 0 : index
    %17 = vector.load %arg5[%c0_11, %c0_12] : memref<1x256xf32, #tpu.memory_space<vmem>>, vector<1x256xf32>
    %18 = vector.broadcast %17 : vector<1x256xf32> to vector<8x256xf32>
    %19 = arith.addf %16, %18 : vector<8x256xf32>
    %cst_13 = arith.constant 5.000000e-01 : f32
    %20 = vector.broadcast %cst_13 : f32 to vector<8x256xf32>
    %21 = arith.mulf %20, %19 : vector<8x256xf32>
    %cst_14 = arith.constant 0.707106769 : f32
    %22 = vector.broadcast %cst_14 : f32 to vector<8x256xf32>
    %23 = arith.mulf %19, %22 : vector<8x256xf32>
    %24 = math.erf %23 : vector<8x256xf32>
    %cst_15 = arith.constant 1.000000e+00 : f32
    %25 = vector.broadcast %cst_15 : f32 to vector<8x256xf32>
    %26 = arith.addf %25, %24 : vector<8x256xf32>
    %27 = arith.mulf %21, %26 : vector<8x256xf32>
    %28 = arith.truncf %27 : vector<8x256xf32> to vector<8x256xbf16>
    %c0_16 = arith.constant 0 : index
    %c0_17 = arith.constant 0 : index
    %29 = vector.load %arg6[%c0_16, %c0_17] : memref<256x128xbf16, #tpu.memory_space<vmem>>, vector<256x128xbf16>
    %cst_18 = arith.constant dense<0.000000e+00> : vector<8x128xf32>
    %30 = tpu.matmul %28, %29, %cst_18 {dimension_numbers = #tpu.dot_dimension_numbers<[1], [0], [0], [1], [0, 0, 1, 1], [], []>} : vector<8x256xbf16>, vector<256x128xbf16>, vector<8x128xf32> -> vector<8x128xf32>
    %c0_19 = arith.constant 0 : index
    %c0_20 = arith.constant 0 : index
    %31 = vector.load %arg7[%c0_19, %c0_20] : memref<1x128xf32, #tpu.memory_space<vmem>>, vector<1x128xf32>
    %32 = vector.broadcast %31 : vector<1x128xf32> to vector<8x128xf32>
    %33 = arith.addf %30, %32 : vector<8x128xf32>
    %34 = arith.mulf %33, %33 : vector<8x128xf32>
    %cst_21 = arith.constant dense<0.000000e+00> : vector<8xf32>
    %35 = vector.multi_reduction <add>, %34, %cst_21 [1] : vector<8x128xf32> to vector<8xf32>
    %36 = vector.shape_cast %35 : vector<8xf32> to vector<8x1xf32>
    %cst_22 = arith.constant 1.000000e-24 : f32
    %37 = vector.broadcast %cst_22 : f32 to vector<8x1xf32>
    %38 = arith.maximumf %36, %37 : vector<8x1xf32>
    %39 = math.rsqrt %38 : vector<8x1xf32>
    %40 = vector.broadcast %39 : vector<8x1xf32> to vector<8x128xf32>
    %41 = arith.mulf %33, %40 : vector<8x128xf32>
    %42 = arith.truncf %41 : vector<8x128xf32> to vector<8x128xbf16>
    %c0_23 = arith.constant 0 : index
    %c0_24 = arith.constant 0 : index
    %43 = vector.load %arg8[%c0_23, %c0_24] : memref<128x256xbf16, #tpu.memory_space<vmem>>, vector<128x256xbf16>
    %cst_25 = arith.constant dense<0.000000e+00> : vector<8x256xf32>
    %44 = tpu.matmul %42, %43, %cst_25 {dimension_numbers = #tpu.dot_dimension_numbers<[1], [0], [0], [1], [0, 0, 1, 1], [], []>} : vector<8x128xbf16>, vector<128x256xbf16>, vector<8x256xf32> -> vector<8x256xf32>
    %c0_26 = arith.constant 0 : index
    %c0_27 = arith.constant 0 : index
    %45 = vector.load %arg9[%c0_26, %c0_27] : memref<8x256xf32, #tpu.memory_space<vmem>>, vector<8x256xf32>
    tpu.vector_store %arg9[%c0_26, %c0_27], %44 {strides = array<i32>} : memref<8x256xf32, #tpu.memory_space<vmem>>, vector<8x256xf32>,
    return
  }
  func.func @transform_0(%arg0: i32) -> (i32, i32) {
    %c0_i32 = arith.constant 0 : i32
    %c0_i32_0 = arith.constant 0 : i32
    return %arg0, %c0_i32 : i32, i32
  }
  func.func @transform_1(%arg0: i32) -> (i32, i32) {
    %c0_i32 = arith.constant 0 : i32
    %c0_i32_0 = arith.constant 0 : i32
    %c0_i32_1 = arith.constant 0 : i32
    return %c0_i32, %c0_i32_0 : i32, i32
  }
  func.func @transform_2(%arg0: i32) -> (i32, i32) {
    %c0_i32 = arith.constant 0 : i32
    %c0_i32_0 = arith.constant 0 : i32
    %c0_i32_1 = arith.constant 0 : i32
    return %c0_i32, %c0_i32_0 : i32, i32
  }
  func.func @transform_3(%arg0: i32) -> (i32, i32) {
    %c0_i32 = arith.constant 0 : i32
    %c0_i32_0 = arith.constant 0 : i32
    %c0_i32_1 = arith.constant 0 : i32
    return %c0_i32, %c0_i32_0 : i32, i32
  }
  func.func @transform_4(%arg0: i32) -> (i32, i32) {
    %c0_i32 = arith.constant 0 : i32
    %c0_i32_0 = arith.constant 0 : i32
    %c0_i32_1 = arith.constant 0 : i32
    return %c0_i32, %c0_i32_0 : i32, i32
  }
  func.func @transform_5(%arg0: i32) -> (i32, i32) {
    %c0_i32 = arith.constant 0 : i32
    %c0_i32_0 = arith.constant 0 : i32
    %c0_i32_1 = arith.constant 0 : i32
    return %c0_i32, %c0_i32_0 : i32, i32
  }
  func.func @transform_6(%arg0: i32) -> (i32, i32) {
    %c0_i32 = arith.constant 0 : i32
    %c0_i32_0 = arith.constant 0 : i32
    %c0_i32_1 = arith.constant 0 : i32
    return %c0_i32, %c0_i32_0 : i32, i32
  }
  func.func @transform_7(%arg0: i32) -> (i32, i32) {
    %c0_i32 = arith.constant 0 : i32
    %c0_i32_0 = arith.constant 0 : i32
    %c0_i32_1 = arith.constant 0 : i32
    return %c0_i32, %c0_i32_0 : i32, i32
  }
  func.func @transform_8(%arg0: i32) -> (i32, i32) {
    %c0_i32 = arith.constant 0 : i32
    %c0_i32_0 = arith.constant 0 : i32
    return %arg0, %c0_i32 : i32, i32
  }
}

module attributes {stable_mosaic.version = 11 : i64} {
  func.func @ibot_head_kernel(%arg0: i32, %arg1: memref<8x128xbf16, #tpu.memory_space<vmem>>, %arg2: memref<128x256xbf16, #tpu.memory_space<vmem>>, %arg3: memref<1x256xf32, #tpu.memory_space<vmem>>, %arg4: memref<256x256xbf16, #tpu.memory_space<vmem>>, %arg5: memref<1x256xf32, #tpu.memory_space<vmem>>, %arg6: memref<256x128xbf16, #tpu.memory_space<vmem>>, %arg7: memref<1x128xf32, #tpu.memory_space<vmem>>, %arg8: memref<128x256xbf16, #tpu.memory_space<vmem>>, %arg9: memref<8x256xf32, #tpu.memory_space<vmem>>) attributes {dimension_semantics = [#tpu.dimension_semantics<parallel>], iteration_bounds = array<i64: 2>, scalar_prefetch = 0 : i64, scratch_operands = 0 : i64, tpu.core_type = #tpu.core_type<tc>, window_params = [{transform_indices = @transform_0, window_bounds = array<i64: 8, 128>}, {pipeline_mode = #tpu.pipeline_mode<synchronous>, transform_indices = @transform_1, window_bounds = array<i64: 128, 256>}, {pipeline_mode = #tpu.pipeline_mode<synchronous>, transform_indices = @transform_2, window_bounds = array<i64: 1, 256>}, {pipeline_mode = #tpu.pipeline_mode<synchronous>, transform_indices = @transform_3, window_bounds = array<i64: 256, 256>}, {pipeline_mode = #tpu.pipeline_mode<synchronous>, transform_indices = @transform_4, window_bounds = array<i64: 1, 256>}, {pipeline_mode = #tpu.pipeline_mode<synchronous>, transform_indices = @transform_5, window_bounds = array<i64: 256, 128>}, {pipeline_mode = #tpu.pipeline_mode<synchronous>, transform_indices = @transform_6, window_bounds = array<i64: 1, 128>}, {pipeline_mode = #tpu.pipeline_mode<synchronous>, transform_indices = @transform_7, window_bounds = array<i64: 128, 256>}, {transform_indices = @transform_8, window_bounds = array<i64: 8, 256>}]} {
    %c0 = arith.constant 0 : index
    %c0_0 = arith.constant 0 : index
    %0 = vector.load %arg1[%c0, %c0_0] : memref<8x128xbf16, #tpu.memory_space<vmem>>, vector<8x128xbf16>
    %c0_1 = arith.constant 0 : index
    %c0_2 = arith.constant 0 : index
    %1 = vector.load %arg2[%c0_1, %c0_2] : memref<128x256xbf16, #tpu.memory_space<vmem>>, vector<128x256xbf16>
    %cst = arith.constant dense<0.000000e+00> : vector<8x256xf32>
    %2 = tpu.matmul %0, %1, %cst {dimension_numbers = #tpu.dot_dimension_numbers<[1], [0], [0], [1], [0, 0, 1, 1], [], []>} : vector<8x128xbf16>, vector<128x256xbf16>, vector<8x256xf32> -> vector<8x256xf32>
    %c0_3 = arith.constant 0 : index
    %c0_4 = arith.constant 0 : index
    %3 = vector.load %arg3[%c0_3, %c0_4] : memref<1x256xf32, #tpu.memory_space<vmem>>, vector<1x256xf32>
    %4 = vector.broadcast %3 : vector<1x256xf32> to vector<8x256xf32>
    %5 = arith.addf %2, %4 : vector<8x256xf32>
    %cst_5 = arith.constant 5.000000e-01 : f32
    %6 = vector.broadcast %cst_5 : f32 to vector<8x256xf32>
    %7 = arith.mulf %6, %5 : vector<8x256xf32>
    %cst_6 = arith.constant 0.707106769 : f32
    %8 = vector.broadcast %cst_6 : f32 to vector<8x256xf32>
    %9 = arith.mulf %5, %8 : vector<8x256xf32>
    %10 = math.erf %9 : vector<8x256xf32>
    %cst_7 = arith.constant 1.000000e+00 : f32
    %11 = vector.broadcast %cst_7 : f32 to vector<8x256xf32>
    %12 = arith.addf %11, %10 : vector<8x256xf32>
    %13 = arith.mulf %7, %12 : vector<8x256xf32>
    %14 = arith.truncf %13 : vector<8x256xf32> to vector<8x256xbf16>
    %c0_8 = arith.constant 0 : index
    %c0_9 = arith.constant 0 : index
    %15 = vector.load %arg4[%c0_8, %c0_9] : memref<256x256xbf16, #tpu.memory_space<vmem>>, vector<256x256xbf16>
    %cst_10 = arith.constant dense<0.000000e+00> : vector<8x256xf32>
    %16 = tpu.matmul %14, %15, %cst_10 {dimension_numbers = #tpu.dot_dimension_numbers<[1], [0], [0], [1], [0, 0, 1, 1], [], []>} : vector<8x256xbf16>, vector<256x256xbf16>, vector<8x256xf32> -> vector<8x256xf32>
    %c0_11 = arith.constant 0 : index
    %c0_12 = arith.constant 0 : index
    %17 = vector.load %arg5[%c0_11, %c0_12] : memref<1x256xf32, #tpu.memory_space<vmem>>, vector<1x256xf32>
    %18 = vector.broadcast %17 : vector<1x256xf32> to vector<8x256xf32>
    %19 = arith.addf %16, %18 : vector<8x256xf32>
    %cst_13 = arith.constant 5.000000e-01 : f32
    %20 = vector.broadcast %cst_13 : f32 to vector<8x256xf32>
    %21 = arith.mulf %20, %19 : vector<8x256xf32>
    %cst_14 = arith.constant 0.707106769 : f32
    %22 = vector.broadcast %cst_14 : f32 to vector<8x256xf32>
    %23 = arith.mulf %19, %22 : vector<8x256xf32>
    %24 = math.erf %23 : vector<8x256xf32>
    %cst_15 = arith.constant 1.000000e+00 : f32
    %25 = vector.broadcast %cst_15 : f32 to vector<8x256xf32>
    %26 = arith.addf %25, %24 : vector<8x256xf32>
    %27 = arith.mulf %21, %26 : vector<8x256xf32>
    %28 = arith.truncf %27 : vector<8x256xf32> to vector<8x256xbf16>
    %c0_16 = arith.constant 0 : index
    %c0_17 = arith.constant 0 : index
    %29 = vector.load %arg6[%c0_16, %c0_17] : memref<256x128xbf16, #tpu.memory_space<vmem>>, vector<256x128xbf16>
    %cst_18 = arith.constant dense<0.000000e+00> : vector<8x128xf32>
    %30 = tpu.matmul %28, %29, %cst_18 {dimension_numbers = #tpu.dot_dimension_numbers<[1], [0], [0], [1], [0, 0, 1, 1], [], []>} : vector<8x256xbf16>, vector<256x128xbf16>, vector<8x128xf32> -> vector<8x128xf32>
    %c0_19 = arith.constant 0 : index
    %c0_20 = arith.constant 0 : index
    %31 = vector.load %arg7[%c0_19, %c0_20] : memref<1x128xf32, #tpu.memory_space<vmem>>, vector<1x128xf32>
    %32 = vector.broadcast %31 : vector<1x128xf32> to vector<8x128xf32>
    %33 = arith.addf %30, %32 : vector<8x128xf32>
    %34 = arith.mulf %33, %33 : vector<8x128xf32>
    %cst_21 = arith.constant dense<0.000000e+00> : vector<8xf32>
    %35 = vector.multi_reduction <add>, %34, %cst_21 [1] : vector<8x128xf32> to vector<8xf32>
    %36 = vector.shape_cast %35 : vector<8xf32> to vector<8x1xf32>
    %cst_22 = arith.constant 1.000000e-24 : f32
    %37 = vector.broadcast %cst_22 : f32 to vector<8x1xf32>
    %38 = arith.maximumf %36, %37 : vector<8x1xf32>
    %39 = math.rsqrt %38 : vector<8x1xf32>
    %40 = vector.broadcast %39 : vector<8x1xf32> to vector<8x128xf32>
    %41 = arith.mulf %33, %40 : vector<8x128xf32>
    %42 = arith.truncf %41 : vector<8x128xf32> to vector<8x128xbf16>
    %c0_23 = arith.constant 0 : index
    %c0_24 = arith.constant 0 : index
    %43 = vector.load %arg8[%c0_23, %c0_24] : memref<128x256xbf16, #tpu.memory_space<vmem>>, vector<128x256xbf16>
    %cst_25 = arith.constant dense<0.000000e+00> : vector<8x256xf32>
    %44 = tpu.matmul %42, %43, %cst_25 {dimension_numbers = #tpu.dot_dimension_numbers<[1], [0], [0], [1], [0, 0, 1, 1], [], []>} : vector<8x128xbf16>, vector<128x256xbf16>, vector<8x256xf32> -> vector<8x256xf32>
    %c0_26 = arith.constant 0 : index
    %c0_27 = arith.constant 0 : index
    %45 = vector.load %arg9[%c0_26, %c0_27] : memref<8x256xf32, #tpu.memory_space<vmem>>, vector<8x256xf32>
    tpu.vector_store %arg9[%c0_26, %c0_27], %44 {strides = array<i32>} : memref<8x256xf32, #tpu.memory_space<vmem>>, vector<8x256xf32>,
    return
  }
  func.func @transform_0(%arg0: i32) -> (i32, i32) {
    %c0_i32 = arith.constant 0 : i32
    %c0_i32_0 = arith.constant 0 : i32
    return %arg0, %c0_i32 : i32, i32
  }
  func.func @transform_1(%arg0: i32) -> (i32, i32) {
    %c0_i32 = arith.constant 0 : i32
    %c0_i32_0 = arith.constant 0 : i32
    %c0_i32_1 = arith.constant 0 : i32
    return %c0_i32, %c0_i32_0 : i32, i32
  }
  func.func @transform_2(%arg0: i32) -> (i32, i32) {
    %c0_i32 = arith.constant 0 : i32
    %c0_i32_0 = arith.constant 0 : i32
    %c0_i32_1 = arith.constant 0 : i32
    return %c0_i32, %c0_i32_0 : i32, i32
  }
  func.func @transform_3(%arg0: i32) -> (i32, i32) {
    %c0_i32 = arith.constant 0 : i32
    %c0_i32_0 = arith.constant 0 : i32
    %c0_i32_1 = arith.constant 0 : i32
    return %c0_i32, %c0_i32_0 : i32, i32
  }
  func.func @transform_4(%arg0: i32) -> (i32, i32) {
    %c0_i32 = arith.constant 0 : i32
    %c0_i32_0 = arith.constant 0 : i32
    %c0_i32_1 = arith.constant 0 : i32
    return %c0_i32, %c0_i32_0 : i32, i32
  }
  func.func @transform_5(%arg0: i32) -> (i32, i32) {
    %c0_i32 = arith.constant 0 : i32
    %c0_i32_0 = arith.constant 0 : i32
    %c0_i32_1 = arith.constant 0 : i32
    return %c0_i32, %c0_i32_0 : i32, i32
  }
  func.func @transform_6(%arg0: i32) -> (i32, i32) {
    %c0_i32 = arith.constant 0 : i32
    %c0_i32_0 = arith.constant 0 : i32
    %c0_i32_1 = arith.constant 0 : i32
    return %c0_i32, %c0_i32_0 : i32, i32
  }
  func.func @transform_7(%arg0: i32) -> (i32, i32) {
    %c0_i32 = arith.constant 0 : i32
    %c0_i32_0 = arith.constant 0 : i32
    %c0_i32_1 = arith.constant 0 : i32
    return %c0_i32, %c0_i32_0 : i32, i32
  }
  func.func @transform_8(%arg0: i32) -> (i32, i32) {
    %c0_i32 = arith.constant 0 : i32
    %c0_i32_0 = arith.constant 0 : i32
    return %arg0, %c0_i32 : i32, i32
  }
}

</mosaic_0001>

<bundles_post_ra>
// kernel: ibot_head_forward.3
= control target key start
LH: loop header
LB: loop body
LE: loop exit
PB: predicated region body
PF: predicated region fallthrough
CT: control target
= control target key end

     0   :  { %13 = vsyncpa [#allocation3], 0  ;;  %s1855_s0 = inlined_call_operand.vmem [shape: bf16[16,128], index: 0, kind: input, shape index: {}]   ;;  %s1856_s1 = inlined_call_operand.vmem [shape: bf16[128,256], index: 1, kind: input, shape index: {}]   ;;  %s1857_s2 = inlined_call_operand.vmem [shape: f32[1,256], index: 2, kind: input, shape index: {}]   ;;  %s1858_s3 = inlined_call_operand.vmem [shape: bf16[256,256], index: 3, kind: input, shape index: {}]   ;;  %s1859_s4 = inlined_call_operand.vmem [shape: f32[1,256], index: 4, kind: input, shape index: {}]   ;;  %s1860_s5 = inlined_call_operand.vmem [shape: bf16[256,128], index: 5, kind: input, shape index: {}]   ;;  %s1861_s6 = inlined_call_operand.vmem [shape: f32[1,128], index: 6, kind: input, shape index: {}]   ;;  %s1862_s7 = inlined_call_operand.vmem [shape: bf16[128,256], index: 7, kind: input, shape index: {}]   ;;  %s1863_s8 = inlined_call_operand.hbm [shape: f32[16,256], index: 8, kind: output, shape index: {}]  }
   0x1   :  { %15 = vsyncpa [#allocation3 + $0x1], 0  ;;  %s1504_s27 = smov 0   ;;  %s1506_s28 = smov 0  }
   0x2   :  { %s1508_s29 = smov 0   ;;  %s1510_s30 = smov 0  }
   0x3 LB: > { %s1525_s9 = sadd.s32 4294967295, %s1455_s30   ;;  %s1116_s10 = sadd.s32 4294967294, %s1455_s30   ;;  %s1455_s30 = sphi %s1510_s30, %s1869_s30   ;;  %s1451_s29 = sphi %s1508_s29, %s1868_s29   ;;  %s1447_s28 = sphi %s1506_s28, %s1867_s28   ;;  %s1443_s27 = sphi %s1504_s27, %s1866_s27  }
   0x4   : > { %s1529_s11 = sadd.s32 1, %s1455_s30   ;;  %s201_s12 = sadd.s32 1, %s1451_s29 }
   0x5   : > { %s198_s13 = ssub.s32 %s1455_s30, %s1529_s11  ;;  %p211_p0 = scmp.ne.s32.totalorder %s1451_s29, %s1447_s28 }
   0x6   : > { %p199_p1 = scmp.eq.s32.totalorder %s198_s13, 0  ;;  %p212_p2 = scmp.eq.s32.totalorder %s1525_s9, 1 }
   0x7   : > { %p217_p3 = scmp.ne.s32.totalorder %s1447_s28, %s1443_s27  ;;  %p218_p4 = scmp.eq.s32.totalorder %s1116_s10, 1 }
   0x8   : > { %s1540_s14 = scalar_select %p199_p1, %s1451_s29, %s201_s12  }
   0x9   : > { %p1542_p5 = por %p212_p2, %p211_p0  ;;  %p1546_p6 = por %p218_p4, %p217_p3 }
   0xa   : > { %p1119_p7 = scmp.ge.s32.totalorder %s1455_s30, 1  ;;  %p264_p8 = scmp.lt.s32.totalorder %s1455_s30, 3 }
   0xc   : > { %p265_p9 = pnand %p1119_p7, %p264_p8 }
   0xd   : > { %v1271_v0 = vld [vmem:[%s1856_s1 + $0x4] ss:$8 sps:$4 sm:$0xff] (!%p265_p9)   ;;  %v1273_v1 = vld [vmem:[%s1856_s1] ss:$8 sps:$4 sm:$0xff] (!%p265_p9)   ;;  %v1457_v2 = vmov (!%p265_p9), 0   ;;  %p297_p10 = scmp.lt.s32.totalorder (!%p265_p9), %s1525_s9, 1  ;;  %v321_v54 = vlaneseq (!%p265_p9) }
   0xe   : > { %268 = sbr.rel (%p265_p9) target bundleno = 1122 (0x462), region = 52  ;;  %443 = vmatprep.mubr.bf16.mxu0 (!%p265_p9), %v1457_v2  ;;  %411 = vmatprep.subr.bf16.mxu0 (!%p265_p9), %v1271_v0  ;;  %v1274_v3 = vld [vmem:[%s1856_s1 + $0x14] ss:$8 sps:$4 sm:$0xff] (!%p265_p9)   ;;  %v1276_v4 = vld [vmem:[%s1856_s1 + $0x10] ss:$8 sps:$4 sm:$0xff] (!%p265_p9)   ;;  %v1343_v50 = vld [vmem:[%s1860_s5 + $0x40] sm:$0xff] (!%p265_p9)  }
   0xf   : > { %412 = vmatpush1.bf16.msra.mxu0 (!%p265_p9), %v1273_v1  ;;  %v1277_v5 = vld [vmem:[%s1856_s1 + $0x24] ss:$8 sps:$4 sm:$0xff] (!%p265_p9)   ;;  %v1279_v6 = vld [vmem:[%s1856_s1 + $0x20] ss:$8 sps:$4 sm:$0xff] (!%p265_p9)   ;;  %v1280_v7 = vld [vmem:[%s1856_s1 + $0x34] ss:$8 sps:$4 sm:$0xff] (!%p265_p9)  }
  0x10   : > { %413 = vmatprep.subr.bf16.mxu0 (!%p265_p9), %v1274_v3  ;;  %v1282_v8 = vld [vmem:[%s1856_s1 + $0x30] ss:$8 sps:$4 sm:$0xff] (!%p265_p9)   ;;  %v1283_v9 = vld [vmem:[%s1856_s1 + $0x44] ss:$8 sps:$4 sm:$0xff] (!%p265_p9)   ;;  %v1297_v11 = vld [vmem:[%s1858_s3] ss:$8 sps:$4 sm:$0xff] (!%p265_p9)  }
  0x11   : > { %v1295_v10 = vld [vmem:[%s1858_s3 + $0x4] ss:$8 sps:$4 sm:$0xff] (!%p265_p9)   ;;  %v1298_v12 = vld [vmem:[%s1858_s3 + $0x14] ss:$8 sps:$4 sm:$0xff] (!%p265_p9)   ;;  %v1285_v13 = vld [vmem:[%s1856_s1 + $0x40] ss:$8 sps:$4 sm:$0xff] (!%p265_p9)  }
  0x12   : > { %668 = vmatprep.subr.bf16.mxu1 (!%p265_p9), %v1295_v10  ;;  %v1300_v14 = vld [vmem:[%s1858_s3 + $0x10] ss:$8 sps:$4 sm:$0xff] (!%p265_p9)   ;;  %v1301_v15 = vld [vmem:[%s1858_s3 + $0x24] ss:$8 sps:$4 sm:$0xff] (!%p265_p9)   ;;  %v1286_v16 = vld [vmem:[%s1856_s1 + $0x54] ss:$8 sps:$4 sm:$0xff] (!%p265_p9)  }
  0x13   : > { %414 = vmatpush1.bf16.msra.mxu0 (!%p265_p9), %v1276_v4  ;;  %669 = vmatpush1.bf16.msra.mxu1 (!%p265_p9), %v1297_v11  ;;  %v1288_v17 = vld [vmem:[%s1856_s1 + $0x50] ss:$8 sps:$4 sm:$0xff] (!%p265_p9)   ;;  %v1303_v18 = vld [vmem:[%s1858_s3 + $0x20] ss:$8 sps:$4 sm:$0xff] (!%p265_p9)   ;;  %v1304_v19 = vld [vmem:[%s1858_s3 + $0x34] ss:$8 sps:$4 sm:$0xff] (!%p265_p9)  }
  0x14   : > { %415 = vmatprep.subr.bf16.mxu0 (!%p265_p9), %v1277_v5  ;;  %670 = vmatprep.subr.bf16.mxu1 (!%p265_p9), %v1298_v12  ;;  %v1289_v20 = vld [vmem:[%s1856_s1 + $0x64] ss:$8 sps:$4 sm:$0xff] (!%p265_p9)   ;;  %v1291_v21 = vld [vmem:[%s1856_s1 + $0x60] ss:$8 sps:$4 sm:$0xff] (!%p265_p9)   ;;  %v1306_v22 = vld [vmem:[%s1858_s3 + $0x30] ss:$8 sps:$4 sm:$0xff] (!%p265_p9)  }
  0x15   : > { %s298_s10 = scalar_select %p297_p10, %s1525_s9, 1  ;;  %v1307_v23 = vld [vmem:[%s1858_s3 + $0x44] ss:$8 sps:$4 sm:$0xff]   ;;  %v1292_v24 = vld [vmem:[%s1856_s1 + $0x74] ss:$8 sps:$4 sm:$0xff]   ;;  %v322_v55 = vshrl.u32 %v321_v54, 7 }
  0x16   : > { %v1309_v25 = vld [vmem:[%s1858_s3 + $0x40] ss:$8 sps:$4 sm:$0xff]   ;;  %v1294_v26 = vld [vmem:[%s1856_s1 + $0x70] ss:$8 sps:$4 sm:$0xff]   ;;  %v1310_v27 = vld [vmem:[%s1858_s3 + $0x54] ss:$8 sps:$4 sm:$0xff]  }
  0x17   : > { %416 = vmatpush1.bf16.msra.mxu0 %v1279_v6  ;;  %671 = vmatpush1.bf16.msra.mxu1 %v1300_v14  ;;  %s1121_s23 = sshll.u32 %s298_s10, 2  ;;  %v1312_v28 = vld [vmem:[%s1858_s3 + $0x50] ss:$8 sps:$4 sm:$0xff]   ;;  %v1313_v30 = vld [vmem:[%s1858_s3 + $0x64] ss:$8 sps:$4 sm:$0xff]   ;;  %v323_v56 = vsub.s32 0, %v322_v55 }
  0x18   : > { %417 = vmatprep.subr.bf16.mxu0 %v1280_v7  ;;  %672 = vmatprep.subr.bf16.mxu1 %v1301_v15  ;;  %s300_s24 = scalar_lea.vmem %s1855_s0, %s1121_s23  ;;  %v1315_v31 = vld [vmem:[%s1858_s3 + $0x60] ss:$8 sps:$4 sm:$0xff]   ;;  %v1316_v32 = vld [vmem:[%s1858_s3 + $0x74] ss:$8 sps:$4 sm:$0xff]   ;;  %v1318_v33 = vld [vmem:[%s1858_s3 + $0x70] ss:$8 sps:$4 sm:$0xff]  }
  0x19   : > { %v302_v29 = vld [vmem:[%s300_s24] sm:$0xf]  ;;  %v1319_v34 = vld [vmem:[%s1858_s3 + $0x84] ss:$8 sps:$4 sm:$0xff]   ;;  %v1322_v36 = vld [vmem:[%s1858_s3 + $0x94] ss:$8 sps:$4 sm:$0xff]  }
  0x1a   : > { %v1321_v35 = vld [vmem:[%s1858_s3 + $0x80] ss:$8 sps:$4 sm:$0xff]   ;;  %v1324_v37 = vld [vmem:[%s1858_s3 + $0x90] ss:$8 sps:$4 sm:$0xff]   ;;  %v1325_v38 = vld [vmem:[%s1858_s3 + $0xa4] ss:$8 sps:$4 sm:$0xff]  }
  0x1b   : > { %418 = vmatpush1.bf16.msra.mxu0 %v1282_v8  ;;  %673 = vmatpush1.bf16.msra.mxu1 %v1303_v18  ;;  %v1327_v39 = vld [vmem:[%s1858_s3 + $0xa0] ss:$8 sps:$4 sm:$0xff]   ;;  %v1328_v40 = vld [vmem:[%s1858_s3 + $0xb4] ss:$8 sps:$4 sm:$0xff]   ;;  %v1330_v41 = vld [vmem:[%s1858_s3 + $0xb0] ss:$8 sps:$4 sm:$0xff]  }
  0x1c   : > { %419 = vmatprep.subr.bf16.mxu0 %v1283_v9  ;;  %674 = vmatprep.subr.bf16.mxu1 %v1304_v19  ;;  %v1331_v42 = vld [vmem:[%s1858_s3 + $0xc4] ss:$8 sps:$4 sm:$0xff]   ;;  %v1333_v43 = vld [vmem:[%s1858_s3 + $0xc0] ss:$8 sps:$4 sm:$0xff]   ;;  %v1334_v44 = vld [vmem:[%s1858_s3 + $0xd4] ss:$8 sps:$4 sm:$0xff]  }
  0x1d   : > { %v1336_v45 = vld [vmem:[%s1858_s3 + $0xd0] ss:$8 sps:$4 sm:$0xff]   ;;  %v1337_v46 = vld [vmem:[%s1858_s3 + $0xe4] ss:$8 sps:$4 sm:$0xff]   ;;  %v1339_v47 = vld [vmem:[%s1858_s3 + $0xe0] ss:$8 sps:$4 sm:$0xff]  }
  0x1e   : > { %v1340_v48 = vld [vmem:[%s1858_s3 + $0xf4] ss:$8 sps:$4 sm:$0xff]   ;;  %v1342_v49 = vld [vmem:[%s1858_s3 + $0xf0] ss:$8 sps:$4 sm:$0xff]   ;;  %v1344_v51 = vld [vmem:[%s1860_s5] sm:$0xff]   ;;  %v327_v58 = vsub.s32 1, %v322_v55 }
  0x1f   : > { %420 = vmatpush1.bf16.msra.mxu0 %v1285_v13  ;;  %675 = vmatpush1.bf16.msra.mxu1 %v1306_v22  ;;  %v1345_v52 = vld [vmem:[%s1860_s5 + $0x48] sm:$0xff]   ;;  %v319_v57 = vld [vmem:[%s1857_s2] sm:$0x3]  ;;  %v1349_v18 = vld [vmem:[%s1860_s5 + $0x58] sm:$0xff]   ;;  %s294_s20 = sand.u32 1, %s1447_s28   ;;  %s1208_s24 = sshll.u32 %s1525_s9, 8 }
  0x20   : > { %421 = vmatprep.subr.bf16.mxu0 %v1286_v16  ;;  %676 = vmatprep.subr.bf16.mxu1 %v1307_v23  ;;  %v1346_v53 = vld [vmem:[%s1860_s5 + $0x8] sm:$0xff]   ;;  %v324_v59 = vrot.slane %v319_v57, %v323_v56  ;;  %v328_v60 = vrot.slane %v319_v57, %v327_v58  ;;  %v1347_v16 = vld [vmem:[%s1860_s5 + $0x50] sm:$0xff]   ;;  %v1350_v19 = vld [vmem:[%s1860_s5 + $0x18] sm:$0xff]   ;;  %s1120_s10 = sshll.u32 %s294_s20, 4  ;;  %s1815_s12 = scalar_lea.hbm %s1863_s8, %s1208_s24 }
  0x21   : > { %v1353_v22 = vld [vmem:[%s1860_s5 + $0x68] sm:$0xff]   ;;  %v1370_v54 = vld [vmem:[%s1862_s7 + $0x34] ss:$8 sps:$4 sm:$0xff]   ;;  %v1368_v55 = vld [vmem:[%s1862_s7 + $0x30] ss:$8 sps:$4 sm:$0xff]   ;;  %s296_s21 = scalar_lea.vmem [#allocation2], %s1120_s10 }
  0x22   : > { %v1354_v23 = vld [vmem:[%s1860_s5 + $0x28] sm:$0xff]   ;;  %s1057_s22 = sshll.u32 %s296_s21, 4  ;;  %s1043_s13 = scalar_lea.sflag [#allocation3], %s294_s20  ;;  %s1810_s22 = int_to_ptr.vmem [resolvable:$true] %s1057_s22 }
  0x23   : > { %422 = vmatpush1.bf16.msra.mxu0 %v1288_v17  ;;  %677 = vmatpush1.bf16.msra.mxu1 %v1309_v25  ;;  %v1348_v17 = vld [vmem:[%s1860_s5 + $0x10] sm:$0xff]   ;;  %s1393_s17 = scalar_lea.vmem %s1810_s22, 256  ;;  %s1458_s9 = smov [#allocation2]  }
  0x24   : > { %423 = vmatprep.subr.bf16.mxu0 %v1289_v20  ;;  %678 = vmatprep.subr.bf16.mxu1 %v1310_v27  ;;  %v1351_v20 = vld [vmem:[%s1860_s5 + $0x60] sm:$0xff]   ;;  %v1356_v25 = vld [vmem:[%s1860_s5 + $0x30] sm:$0xff]   ;;  %v1358_v27 = vld [vmem:[%s1860_s5 + $0x38] sm:$0xff]   ;;  %p1394_p11 = scmp.ne.s32.totalorder %s1810_s22, %s1393_s17  ;;  %s1397_s18 = sshll.u32 %s1458_s9, 4  ;;  %s1398_s18 = int_to_ptr.vmem [resolvable:$false] %s1397_s18 }
  0x25   : > { %s1399_s23 = scalar_lea.vmem %s1398_s18, 512  ;;  %p1400_p0 = scmp.lt.s32.totalorder %s1810_s22, %s1398_s18 }
  0x26   : > { %p1395_p12 = pnand %p1394_p11, %p1542_p5  ;;  %p1401_p1 = scmp.lt.s32.totalorder %s1399_s23, %s1393_s17 }
  0x27   : > { %424 = vmatpush1.bf16.msra.mxu0 %v1291_v21  ;;  %679 = vmatpush1.bf16.msra.mxu1 %v1312_v28  ;;  %v1352_v21 = vld [vmem:[%s1860_s5 + $0x20] sm:$0xff]  }
  0x28   : > { %425 = vmatprep.subr.bf16.mxu0 %v1292_v24  ;;  %680 = vmatprep.subr.bf16.mxu1 %v1313_v30  ;;  %v1355_v24 = vld [vmem:[%s1860_s5 + $0x70] sm:$0xff]   ;;  %v496_v28 = vld [vmem:[%s1859_s4] sm:$0x3]  ;;  %p1396_p13 = pneg %p1395_p12  ;;  %p1402_p2 = por %p1401_p1, %p1400_p0 }
  0x29   : > { %v505_v30 = vrot.slane %v496_v28, %v327_v58  ;;  %v1170_v58 = vld [vmem:[%s1861_s6] ss:$0 sm:$0xff] }
  0x2a   : > { %p1403_p3 = pnand %p1402_p2, %p1396_p13 }
  0x2b   : > { %426 = vmatpush1.bf16.msra.mxu0 %v1294_v26  ;;  %681 = vmatpush1.bf16.msra.mxu1 %v1315_v31  ;;  %v1357_v26 = vld [vmem:[%s1860_s5 + $0x78] sm:$0xff]  }
  0x2c   : > { %682 = vmatprep.subr.bf16.mxu1 %v1316_v32  ;;  %1209 = vmatprep.subr.bf16.mxu0 %v1343_v50  ;;  %v1361_v50 = vld [vmem:[%s1862_s7 + $0x4] ss:$8 sps:$4 sm:$0xff]  }
  0x2e   : > { %444 = vmatmul.mubr.bf16.vlgmr.msra.gmra.mrb[0].mxu0 %v302_v29  ;;  %v501_v29 = vrot.slane %v496_v28, %v323_v56 }
  0x2f   : > { %683 = vmatpush1.bf16.msra.mxu1 %v1318_v33  ;;  %1210 = vmatpush3.bf16.msra.mxu0 %v1344_v51  ;;  %v1364_v51 = vld [vmem:[%s1862_s7 + $0x14] ss:$8 sps:$4 sm:$0xff]  }
  0x30   : > { %684 = vmatprep.subr.bf16.mxu1 %v1319_v34  ;;  %1211 = vmatprep.subr.bf16.mxu0 %v1345_v52  ;;  %v1362_v52 = vld [vmem:[%s1862_s7 + $0x10] ss:$8 sps:$4 sm:$0xff]  }
  0x33   : > { %685 = vmatpush1.bf16.msra.mxu1 %v1321_v35  ;;  %1212 = vmatpush3.bf16.msra.mxu0 %v1346_v53  ;;  %v1365_v53 = vld [vmem:[%s1862_s7 + $0x20] ss:$8 sps:$4 sm:$0xff]  }
  0x34   : > { %686 = vmatprep.subr.bf16.mxu1 %v1322_v36  ;;  %1213 = vmatprep.subr.bf16.mxu0 %v1347_v16 }
  0x37   : > { %687 = vmatpush1.bf16.msra.mxu1 %v1324_v37  ;;  %1214 = vmatpush3.bf16.msra.mxu0 %v1348_v17 }
  0x38   : > { %688 = vmatprep.subr.bf16.mxu1 %v1325_v38  ;;  %1215 = vmatprep.subr.bf16.mxu0 %v1349_v18 }
  0x3b   : > { %689 = vmatpush1.bf16.msra.mxu1 %v1327_v39  ;;  %1216 = vmatpush3.bf16.msra.mxu0 %v1350_v19 }
  0x3c   : > { %690 = vmatprep.subr.bf16.mxu1 %v1328_v40  ;;  %1217 = vmatprep.subr.bf16.mxu0 %v1351_v20 }
  0x3f   : > { %691 = vmatpush1.bf16.msra.mxu1 %v1330_v41  ;;  %1218 = vmatpush3.bf16.msra.mxu0 %v1352_v21 }
  0x40   : > { %692 = vmatprep.subr.bf16.mxu1 %v1331_v42  ;;  %1219 = vmatprep.subr.bf16.mxu0 %v1353_v22 }
  0x43   : > { %693 = vmatpush1.bf16.msra.mxu1 %v1333_v43  ;;  %1220 = vmatpush3.bf16.msra.mxu0 %v1354_v23 }
  0x44   : > { %694 = vmatprep.subr.bf16.mxu1 %v1334_v44  ;;  %1221 = vmatprep.subr.bf16.mxu0 %v1355_v24 }
  0x47   : > { %695 = vmatpush1.bf16.msra.mxu1 %v1336_v45  ;;  %1222 = vmatpush3.bf16.msra.mxu0 %v1356_v25 }
  0x48   : > { %696 = vmatprep.subr.bf16.mxu1 %v1337_v46  ;;  %1223 = vmatprep.subr.bf16.mxu0 %v1357_v26 }
  0x4b   : > { %697 = vmatpush1.bf16.msra.mxu1 %v1339_v47  ;;  %1224 = vmatpush3.bf16.msra.mxu0 %v1358_v27 }
  0x4c   : > { %698 = vmatprep.subr.bf16.mxu1 %v1340_v48  ;;  %999 = vmatprep.subr.bf16.mxu0 %v1361_v50 }
  0x4f   : > { %699 = vmatpush1.bf16.msra.mxu1 %v1342_v49  ;;  %v1359_v49 = vld [vmem:[%s1862_s7] ss:$8 sps:$4 sm:$0xff]  }
 0x101   : > { %v445_v61 = vpop.f32.mrb[0].mxu0 }
 0x102   : > { %v446_v62 = vadd.f32 %v445_v61, %v324_v59  ;;  %v447_v63 = vpop.f32.mrb[1].mxu0 }
 0x103   : > { %v448_v0 = vadd.f32 %v447_v63, %v328_v60  ;;  %v449_v1 = vpop.f32.mrb[2].mxu0 }
 0x104   : > { %v454_v3 = vmul.f32 0.70710677, %v446_v62  ;;  %v450_v4 = vpop.f32.mrb[3].mxu0  ;;  %v452_v8 = vmul.f32 0.5, %v446_v62  ;;  %v1371_v1 = vld [vmem:[%s1862_s7 + $0x40] ss:$8 sps:$4 sm:$0xff]  }
 0x105   : > { %v455_v5 = vmul.f32 0.70710677, %v448_v0  ;;  %v453_v10 = vmul.f32 0.5, %v448_v0  ;;  %v1373_v0 = vld [vmem:[%s1862_s7 + $0x44] ss:$8 sps:$4 sm:$0xff]  }
 0x106   : > { %1383 = verf.f32 %v454_v3  ;;  %v1374_v3 = vld [vmem:[%s1862_s7 + $0x50] ss:$8 sps:$4 sm:$0xff]   ;;  %v1376_v4 = vld [vmem:[%s1862_s7 + $0x54] ss:$8 sps:$4 sm:$0xff]  }
 0x107   : > { %1385 = verf.f32 %v455_v5  ;;  %v1379_v5 = vld [vmem:[%s1862_s7 + $0x64] ss:$8 sps:$4 sm:$0xff]  }
 0x110   : > { %v1384_v6 = vpop.eup %1383 }
 0x111   : > { %v1386_v7 = vpop.eup %1385  ;;  %v458_v9 = vadd.f32 1.0, %v1384_v6  ;;  %v1377_v6 = vld [vmem:[%s1862_s7 + $0x60] ss:$8 sps:$4 sm:$0xff]  }
 0x112   : > { %v459_v11 = vadd.f32 1.0, %v1386_v7  ;;  %v1382_v7 = vld [vmem:[%s1862_s7 + $0x74] ss:$8 sps:$4 sm:$0xff]  }
 0x113   : > { %v460_v12 = vmul.f32 %v458_v9, %v452_v8  ;;  %v1380_v8 = vld [vmem:[%s1862_s7 + $0x70] ss:$8 sps:$4 sm:$0xff]  }
 0x114   : > { %v461_v13 = vmul.f32 %v459_v11, %v453_v10 }
 0x115   : > { %v462_v15 = vpack.c.bf16 %v460_v12, %v460_v12 }
 0x116   : > { %v463_v14 = vpack.c.bf16 %v461_v13, %v461_v13 }
 0x118   : > { %700 = vmatprep.mubr.bf16.mxu1 %v463_v14 }
 0x119   : > { %701 = vmatmul.mubr.bf16.vlgmr.msra.gmra.mrb[0].mxu1 %v462_v15 }
 0x1ec   : > { %v702_v31 = vpop.f32.mrb[0].mxu1 }
 0x1ed   : > { %v703_v32 = vadd.f32 %v702_v31, %v501_v29  ;;  %v704_v33 = vpop.f32.mrb[1].mxu1 }
 0x1ee   : > { %v705_v34 = vadd.f32 %v704_v33, %v505_v30  ;;  %v706_v35 = vpop.f32.mrb[2].mxu1 }
 0x1ef   : > { %v711_v36 = vmul.f32 0.70710677, %v703_v32  ;;  %v707_v37 = vpop.f32.mrb[3].mxu1  ;;  %v709_v41 = vmul.f32 0.5, %v703_v32 }
 0x1f0   : > { %v712_v38 = vmul.f32 0.70710677, %v705_v34  ;;  %v710_v43 = vmul.f32 0.5, %v705_v34 }
 0x1f1   : > { %1387 = verf.f32 %v711_v36 }
 0x1f2   : > { %1389 = verf.f32 %v712_v38 }
 0x1fb   : > { %v1388_v39 = vpop.eup %1387 }
 0x1fc   : > { %v1390_v40 = vpop.eup %1389  ;;  %v715_v42 = vadd.f32 1.0, %v1388_v39 }
 0x1fd   : > { %v716_v44 = vadd.f32 1.0, %v1390_v40 }
 0x1fe   : > { %v717_v45 = vmul.f32 %v715_v42, %v709_v41 }
 0x1ff   : > { %v718_v46 = vmul.f32 %v716_v44, %v710_v43 }
 0x200   : > { %v719_v48 = vpack.c.bf16 %v717_v45, %v717_v45 }
 0x201   : > { %v720_v47 = vpack.c.bf16 %v718_v46, %v718_v46 }
 0x203   : > { %888 = vmatprep.mubr.bf16.mxu0 %v720_v47 }
 0x204   : > { %889 = vmatmul.mubr.bf16.vlgmr.msra.gmra.mrb[4].mxu0 %v719_v48 }
 0x205   : > { %1031 = vmatprep.mubr.bf16.mxu0 %v1457_v2  ;;  %1000 = vmatpush1.bf16.msra.mxu0 %v1359_v49  ;;  %v1367_v2 = vld [vmem:[%s1862_s7 + $0x24] ss:$8 sps:$4 sm:$0xff]  }
 0x206   : > { %1001 = vmatprep.subr.bf16.mxu0 %v1364_v51 }
 0x209   : > { %1002 = vmatpush1.bf16.msra.mxu0 %v1362_v52 }
 0x20a   : > { %1003 = vmatprep.subr.bf16.mxu0 %v1367_v2 }
 0x20d   : > { %1004 = vmatpush1.bf16.msra.mxu0 %v1365_v53 }
 0x20e   : > { %1005 = vmatprep.subr.bf16.mxu0 %v1370_v54 }
 0x211   : > { %1006 = vmatpush1.bf16.msra.mxu0 %v1368_v55 }
 0x212   : > { %1007 = vmatprep.subr.bf16.mxu0 %v1373_v0 }
 0x215   : > { %1008 = vmatpush1.bf16.msra.mxu0 %v1371_v1 }
 0x216   : > { %1009 = vmatprep.subr.bf16.mxu0 %v1376_v4 }
 0x219   : > { %1010 = vmatpush1.bf16.msra.mxu0 %v1374_v3 }
 0x21a   : > { %1011 = vmatprep.subr.bf16.mxu0 %v1379_v5 }
 0x21d   : > { %1012 = vmatpush1.bf16.msra.mxu0 %v1377_v6 }
 0x21e   : > { %1013 = vmatprep.subr.bf16.mxu0 %v1382_v7 }
 0x221   : > { %1014 = vmatpush1.bf16.msra.mxu0 %v1380_v8 }
 0x2d7   : > { %v1225_v56 = vpop.f32.mrb[4].mxu0 }
 0x2d8   : > { %v1226_v57 = vpop.f32.mrb[5].mxu0 }
 0x2d9   : > { %v1227_v59 = vadd.f32 %v1226_v57, %v1225_v56  ;;  %v1228_v60 = vpop.f32.mrb[6].mxu0 }
 0x2da   : > { %v1229_v61 = vpop.f32.mrb[7].mxu0 }
 0x2db   : > { %v891_v62 = vadd.f32 %v1227_v59, %v1170_v58 }
 0x2dd   : > { %v896_v63 = vmul.f32 %v891_v62, %v891_v62 }
 0x2df   : > { %897 = vadd.xlane.f32.xlu0 %v896_v63 }
 0x36c   : > { %v898_v9 = vpop.xlane.xlu0 %897 }
 0x36d   : > { %v899_v10 = vmax.f32 %v898_v9, 1e-24 }
 0x36f   : > { %1391 = vrsqrt.f32 %v899_v10 }
 0x379   : > { %v1392_v11 = vpop.eup %1391 }
 0x37a   : > { %v901_v12 = vmul.f32 %v1392_v11, %v891_v62 }
 0x37c   : > { %v902_v13 = vpack.c.bf16 %v901_v12, %v901_v12 }
 0x37e   : > { %1032 = vmatmul.mubr.bf16.vlgmr.msra.gmra.mrb[8].mxu0 %v902_v13 }
 0x451   : > { %v1033_v14 = vpop.f32.mrb[8].mxu0 }
 0x452   : > { %1040 = vst [vmem:[%s296_s21] sm:$0xff] %v1033_v14  ;;  %v1035_v15 = vpop.f32.mrb[9].mxu0 }
 0x453   : > { %1041 = vst [vmem:[%s296_s21 + $0x8] sm:$0xff] %v1035_v15  ;;  %v1037_v16 = vpop.f32.mrb[10].mxu0 }
 0x454   : > { %v1038_v17 = vpop.f32.mrb[11].mxu0 }
 0x455   : > { %1406 = shalt.err (!%p1403_p3)
}
 0x456   : > { %s1407_s19 = scalar_lea.hbm %s1815_s12, 256  ;;  %s1411_s21 = scalar_lea.hbm %s1863_s8, 512 }
 0x457   : > { %p1408_p4 = scmp.ne.s32.totalorder %s1815_s12, %s1407_s19  ;;  %p1412_p9 = scmp.lt.u32.totalorder %s1815_s12, %s1863_s8 }
 0x458   : > { %p1413_p10 = scmp.lt.u32.totalorder %s1411_s21, %s1407_s19  ;;  %p1415_p12 = scmp.lt.u32.totalorder %s1407_s19, %s1815_s12 }
 0x459   : > { %p1409_p7 = pnand %p1408_p4, %p1542_p5 }
 0x45a   : > { %p1414_p11 = por %p1413_p10, %p1412_p9 }
 0x45b   : > { %p1410_p8 = pneg %p1409_p7 }
 0x45c   : > { %p1416_p13 = por %p1415_p12, %p1414_p11 }
 0x45e   : > { %p1417_p0 = pnand %p1416_p13, %p1410_p8 }
 0x460   : > { %1420 = shalt.err (!%p1417_p0)
}
 0x461   : > { %1231 = dma.vmem_to_hbm [thread:$0]  (%p1542_p5), %s1810_s22, 256, %s1815_s12, %s1043_s13  }
 0x462 PF: > { %p1237_p1 = scmp.ge.s32.totalorder %s1455_s30, 2  ;;  %s1069_s26 = sand.u32 1, %s1443_s27  }
 0x463   : > { %s1070_s17 = scalar_lea.sflag [#allocation3], %s1069_s26 }
 0x464   : > { %p1234_p2 = pnand %p1237_p1, %p1546_p6 }
 0x466   : > { %1438 = dma.done.wait (!%p1234_p2), %s1070_s17, 256  }
 0x467   : > { %1440 = vsyncadd (!%p1234_p2), %s1070_s17, 4294967040  ;;  %p18_p3 = scmp.ge.s32.totalorder %s1529_s11, 4   ;;  %s1866_s27 = smov %s1447_s28 }
 0x468   : > { %s1867_s28 = smov %s1451_s29  ;;  %s1868_s29 = smov %s1540_s14 }
 0x469   : > { %s1869_s30 = smov %s1529_s11  ;;  %20 = sbr.rel (!%p18_p3) target bundleno = 3 (0x3), region = 87 }
 0x470   :  { %1075 = vsyncpa [#allocation3], 1 }
 0x471   :  { %1077 = vsyncpa [#allocation3 + $0x1], 1 }

// kernel: ibot_head_forward.2
= control target key start
LH: loop header
LB: loop body
LE: loop exit
PB: predicated region body
PF: predicated region fallthrough
CT: control target
= control target key end

     0   :  { %13 = vsyncpa [#allocation3], 0  ;;  %s1042_s27 = smov [#allocation2]   ;;  %s1315_s0 = inlined_call_operand.vmem [shape: bf16[8,128], index: 0, kind: input, shape index: {}]   ;;  %s1316_s1 = inlined_call_operand.vmem [shape: bf16[128,256], index: 1, kind: input, shape index: {}]   ;;  %s1317_s2 = inlined_call_operand.vmem [shape: f32[1,256], index: 2, kind: input, shape index: {}]   ;;  %s1318_s3 = inlined_call_operand.vmem [shape: bf16[256,256], index: 3, kind: input, shape index: {}]   ;;  %s1319_s4 = inlined_call_operand.vmem [shape: f32[1,256], index: 4, kind: input, shape index: {}]   ;;  %s1320_s5 = inlined_call_operand.hbm [shape: bf16[256,128], index: 5, kind: input, shape index: {}]   ;;  %s1321_s6 = inlined_call_operand.vmem [shape: f32[1,128], index: 6, kind: input, shape index: {}]   ;;  %s1322_s7 = inlined_call_operand.vmem [shape: bf16[128,256], index: 7, kind: input, shape index: {}]   ;;  %s1323_s8 = inlined_call_operand.vmem [shape: f32[8,256], index: 8, kind: output, shape index: {}]  }
   0x1   :  { %s29_s28 = sshll.u32 %s1042_s27, 4  ;;  %s1018_s9 = scalar_lea.hbm %s1320_s5, 2048  ;;  %s30_s28 = int_to_ptr.vmem [resolvable:$true] %s29_s28 }
   0x2   :  { %p1019_p0 = scmp.ne.s32.totalorder %s1320_s5, %s1018_s9  ;;  %p1022_p1 = scmp.lt.u32.totalorder %s1018_s9, %s1320_s5 }
   0x4   :  { %p1024_p2 = pnand %p1022_p1, %p1019_p0 }
   0x6   :  { %1027 = shalt.err (!%p1024_p2)
}
   0x7   :  { %s1028_s14 = scalar_lea.vmem %s30_s28, 2048  ;;  %p1033_p4 = scmp.lt.s32.totalorder %s30_s28, %s30_s28 }
   0x8   :  { %p1029_p3 = scmp.ne.s32.totalorder %s30_s28, %s1028_s14  ;;  %p1034_p5 = scmp.lt.s32.totalorder %s1028_s14, %s1028_s14 }
   0xa   :  { %p1035_p6 = por %p1034_p5, %p1033_p4 }
   0xc   :  { %p1036_p7 = pnand %p1035_p6, %p1029_p3 }
   0xe   :  { %1039 = shalt.err (!%p1036_p7)
}
   0xf   :  { %s1043_s15 = smov 64   ;;  %s1044_s16 = smov 4  }
  0x10   :  { %35 = dma.hbm_to_vmem [thread:$0]  %s1320_s5, 2048, %s30_s28, [#allocation3], %s1043_s15, %s1043_s15, %s1044_s16  }
  0x11   :  { %1040 = dma.done.wait [#allocation3], 2048  }
  0x12   :  { %1041 = vsyncadd [#allocation3], 4294965248  ;;  %v1045_v0 = vmov 0   ;;  %v896_v1 = vld [vmem:[%s1316_s1 + $0x4] ss:$8 sps:$4 sm:$0xff]   ;;  %v63_v54 = vlaneseq }
  0x13   :  { %185 = vmatprep.mubr.bf16.mxu0 %v1045_v0  ;;  %v898_v2 = vld [vmem:[%s1316_s1] ss:$8 sps:$4 sm:$0xff]   ;;  %153 = vmatprep.subr.bf16.mxu0 %v896_v1  ;;  %v899_v3 = vld [vmem:[%s1316_s1 + $0x14] ss:$8 sps:$4 sm:$0xff]   ;;  %v901_v4 = vld [vmem:[%s1316_s1 + $0x10] ss:$8 sps:$4 sm:$0xff]  }
  0x14   :  { %154 = vmatpush1.bf16.msra.mxu0 %v898_v2  ;;  %v902_v5 = vld [vmem:[%s1316_s1 + $0x24] ss:$8 sps:$4 sm:$0xff]   ;;  %v904_v6 = vld [vmem:[%s1316_s1 + $0x20] ss:$8 sps:$4 sm:$0xff]   ;;  %v905_v7 = vld [vmem:[%s1316_s1 + $0x34] ss:$8 sps:$4 sm:$0xff]  }
  0x15   :  { %155 = vmatprep.subr.bf16.mxu0 %v899_v3  ;;  %v907_v8 = vld [vmem:[%s1316_s1 + $0x30] ss:$8 sps:$4 sm:$0xff]   ;;  %v908_v9 = vld [vmem:[%s1316_s1 + $0x44] ss:$8 sps:$4 sm:$0xff]   ;;  %v922_v11 = vld [vmem:[%s1318_s3] ss:$8 sps:$4 sm:$0xff]  }
  0x16   :  { %v920_v10 = vld [vmem:[%s1318_s3 + $0x4] ss:$8 sps:$4 sm:$0xff]   ;;  %v923_v12 = vld [vmem:[%s1318_s3 + $0x14] ss:$8 sps:$4 sm:$0xff]   ;;  %v910_v13 = vld [vmem:[%s1316_s1 + $0x40] ss:$8 sps:$4 sm:$0xff]  }
  0x17   :  { %410 = vmatprep.subr.bf16.mxu1 %v920_v10  ;;  %v925_v14 = vld [vmem:[%s1318_s3 + $0x10] ss:$8 sps:$4 sm:$0xff]   ;;  %v926_v15 = vld [vmem:[%s1318_s3 + $0x24] ss:$8 sps:$4 sm:$0xff]   ;;  %v911_v16 = vld [vmem:[%s1316_s1 + $0x54] ss:$8 sps:$4 sm:$0xff]  }
  0x18   :  { %156 = vmatpush1.bf16.msra.mxu0 %v901_v4  ;;  %411 = vmatpush1.bf16.msra.mxu1 %v922_v11  ;;  %v913_v17 = vld [vmem:[%s1316_s1 + $0x50] ss:$8 sps:$4 sm:$0xff]   ;;  %v928_v18 = vld [vmem:[%s1318_s3 + $0x20] ss:$8 sps:$4 sm:$0xff]   ;;  %v929_v19 = vld [vmem:[%s1318_s3 + $0x34] ss:$8 sps:$4 sm:$0xff]  }
  0x19   :  { %157 = vmatprep.subr.bf16.mxu0 %v902_v5  ;;  %412 = vmatprep.subr.bf16.mxu1 %v923_v12  ;;  %v914_v20 = vld [vmem:[%s1316_s1 + $0x64] ss:$8 sps:$4 sm:$0xff]   ;;  %v916_v21 = vld [vmem:[%s1316_s1 + $0x60] ss:$8 sps:$4 sm:$0xff]   ;;  %v931_v22 = vld [vmem:[%s1318_s3 + $0x30] ss:$8 sps:$4 sm:$0xff]  }
  0x1a   :  { %v932_v23 = vld [vmem:[%s1318_s3 + $0x44] ss:$8 sps:$4 sm:$0xff]   ;;  %v917_v24 = vld [vmem:[%s1316_s1 + $0x74] ss:$8 sps:$4 sm:$0xff]   ;;  %v934_v25 = vld [vmem:[%s1318_s3 + $0x40] ss:$8 sps:$4 sm:$0xff]  }
  0x1b   :  { %v919_v26 = vld [vmem:[%s1316_s1 + $0x70] ss:$8 sps:$4 sm:$0xff]   ;;  %v935_v27 = vld [vmem:[%s1318_s3 + $0x54] ss:$8 sps:$4 sm:$0xff]   ;;  %v44_v29 = vld [vmem:[%s1315_s0] sm:$0xf] }
  0x1c   :  { %158 = vmatpush1.bf16.msra.mxu0 %v904_v6  ;;  %413 = vmatpush1.bf16.msra.mxu1 %v925_v14  ;;  %v937_v28 = vld [vmem:[%s1318_s3 + $0x50] ss:$8 sps:$4 sm:$0xff]   ;;  %v938_v30 = vld [vmem:[%s1318_s3 + $0x64] ss:$8 sps:$4 sm:$0xff]   ;;  %v940_v31 = vld [vmem:[%s1318_s3 + $0x60] ss:$8 sps:$4 sm:$0xff]  }
  0x1d   :  { %159 = vmatprep.subr.bf16.mxu0 %v905_v7  ;;  %414 = vmatprep.subr.bf16.mxu1 %v926_v15  ;;  %v941_v32 = vld [vmem:[%s1318_s3 + $0x74] ss:$8 sps:$4 sm:$0xff]   ;;  %v943_v33 = vld [vmem:[%s1318_s3 + $0x70] ss:$8 sps:$4 sm:$0xff]   ;;  %v944_v34 = vld [vmem:[%s1318_s3 + $0x84] ss:$8 sps:$4 sm:$0xff]  }
  0x1e   :  { %v946_v35 = vld [vmem:[%s1318_s3 + $0x80] ss:$8 sps:$4 sm:$0xff]   ;;  %v947_v36 = vld [vmem:[%s1318_s3 + $0x94] ss:$8 sps:$4 sm:$0xff]   ;;  %v949_v37 = vld [vmem:[%s1318_s3 + $0x90] ss:$8 sps:$4 sm:$0xff]  }
  0x1f   :  { %v950_v38 = vld [vmem:[%s1318_s3 + $0xa4] ss:$8 sps:$4 sm:$0xff]   ;;  %v952_v39 = vld [vmem:[%s1318_s3 + $0xa0] ss:$8 sps:$4 sm:$0xff]   ;;  %v953_v40 = vld [vmem:[%s1318_s3 + $0xb4] ss:$8 sps:$4 sm:$0xff]  }
  0x20   :  { %160 = vmatpush1.bf16.msra.mxu0 %v907_v8  ;;  %415 = vmatpush1.bf16.msra.mxu1 %v928_v18  ;;  %v955_v41 = vld [vmem:[%s1318_s3 + $0xb0] ss:$8 sps:$4 sm:$0xff]   ;;  %v956_v42 = vld [vmem:[%s1318_s3 + $0xc4] ss:$8 sps:$4 sm:$0xff]   ;;  %v958_v43 = vld [vmem:[%s1318_s3 + $0xc0] ss:$8 sps:$4 sm:$0xff]  }
  0x21   :  { %161 = vmatprep.subr.bf16.mxu0 %v908_v9  ;;  %416 = vmatprep.subr.bf16.mxu1 %v929_v19  ;;  %v959_v44 = vld [vmem:[%s1318_s3 + $0xd4] ss:$8 sps:$4 sm:$0xff]   ;;  %v961_v45 = vld [vmem:[%s1318_s3 + $0xd0] ss:$8 sps:$4 sm:$0xff]   ;;  %v962_v46 = vld [vmem:[%s1318_s3 + $0xe4] ss:$8 sps:$4 sm:$0xff]  }
  0x22   :  { %v964_v47 = vld [vmem:[%s1318_s3 + $0xe0] ss:$8 sps:$4 sm:$0xff]   ;;  %v965_v48 = vld [vmem:[%s1318_s3 + $0xf4] ss:$8 sps:$4 sm:$0xff]   ;;  %v967_v49 = vld [vmem:[%s1318_s3 + $0xf0] ss:$8 sps:$4 sm:$0xff]  }
  0x23   :  { %v968_v50 = vld [vmem:[#allocation2 + $0x40] sm:$0xff]   ;;  %v970_v52 = vld [vmem:[#allocation2 + $0x48] sm:$0xff]   ;;  %v64_v55 = vshrl.u32 %v63_v54, 7  ;;  %v974_v18 = vld [vmem:[#allocation2 + $0x58] sm:$0xff]  }
  0x24   :  { %162 = vmatpush1.bf16.msra.mxu0 %v910_v13  ;;  %417 = vmatpush1.bf16.msra.mxu1 %v931_v22  ;;  %v969_v51 = vld [vmem:[#allocation2] sm:$0xff]   ;;  %v971_v53 = vld [vmem:[#allocation2 + $0x8] sm:$0xff]   ;;  %v975_v19 = vld [vmem:[#allocation2 + $0x18] sm:$0xff]  }
  0x25   :  { %163 = vmatprep.subr.bf16.mxu0 %v911_v16  ;;  %418 = vmatprep.subr.bf16.mxu1 %v932_v23  ;;  %v65_v56 = vsub.s32 0, %v64_v55  ;;  %v61_v57 = vld [vmem:[%s1317_s2] sm:$0x3]  ;;  %v69_v58 = vsub.s32 1, %v64_v55  ;;  %v972_v16 = vld [vmem:[#allocation2 + $0x50] sm:$0xff]   ;;  %v978_v22 = vld [vmem:[#allocation2 + $0x68] sm:$0xff]  }
  0x26   :  { %v979_v23 = vld [vmem:[#allocation2 + $0x28] sm:$0xff]   ;;  %v995_v54 = vld [vmem:[%s1322_s7 + $0x34] ss:$8 sps:$4 sm:$0xff]   ;;  %v993_v55 = vld [vmem:[%s1322_s7 + $0x30] ss:$8 sps:$4 sm:$0xff]  }
  0x27   :  { %v66_v59 = vrot.slane %v61_v57, %v65_v56  ;;  %v70_v60 = vrot.slane %v61_v57, %v69_v58 }
  0x28   :  { %164 = vmatpush1.bf16.msra.mxu0 %v913_v17  ;;  %419 = vmatpush1.bf16.msra.mxu1 %v934_v25  ;;  %v973_v17 = vld [vmem:[#allocation2 + $0x10] sm:$0xff]  }
  0x29   :  { %165 = vmatprep.subr.bf16.mxu0 %v914_v20  ;;  %420 = vmatprep.subr.bf16.mxu1 %v935_v27  ;;  %v976_v20 = vld [vmem:[#allocation2 + $0x60] sm:$0xff]   ;;  %v981_v25 = vld [vmem:[#allocation2 + $0x30] sm:$0xff]   ;;  %v983_v27 = vld [vmem:[#allocation2 + $0x38] sm:$0xff]  }
  0x2c   :  { %166 = vmatpush1.bf16.msra.mxu0 %v916_v21  ;;  %421 = vmatpush1.bf16.msra.mxu1 %v937_v28  ;;  %v977_v21 = vld [vmem:[#allocation2 + $0x20] sm:$0xff]  }
  0x2d   :  { %167 = vmatprep.subr.bf16.mxu0 %v917_v24  ;;  %422 = vmatprep.subr.bf16.mxu1 %v938_v30  ;;  %v980_v24 = vld [vmem:[#allocation2 + $0x70] sm:$0xff]   ;;  %v238_v28 = vld [vmem:[%s1319_s4] sm:$0x3] }
  0x2e   :  { %v247_v30 = vrot.slane %v238_v28, %v69_v58  ;;  %v837_v58 = vld [vmem:[%s1321_s6] ss:$0 sm:$0xff] }
  0x30   :  { %168 = vmatpush1.bf16.msra.mxu0 %v919_v26  ;;  %423 = vmatpush1.bf16.msra.mxu1 %v940_v31  ;;  %v982_v26 = vld [vmem:[#allocation2 + $0x78] sm:$0xff]  }
  0x31   :  { %424 = vmatprep.subr.bf16.mxu1 %v941_v32  ;;  %870 = vmatprep.subr.bf16.mxu0 %v968_v50  ;;  %v986_v50 = vld [vmem:[%s1322_s7 + $0x4] ss:$8 sps:$4 sm:$0xff]  }
  0x33   :  { %186 = vmatmul.mubr.bf16.vlgmr.msra.gmra.mrb[0].mxu0 %v44_v29  ;;  %v243_v29 = vrot.slane %v238_v28, %v65_v56 }
  0x34   :  { %425 = vmatpush1.bf16.msra.mxu1 %v943_v33  ;;  %871 = vmatpush3.bf16.msra.mxu0 %v969_v51  ;;  %v989_v51 = vld [vmem:[%s1322_s7 + $0x14] ss:$8 sps:$4 sm:$0xff]  }
  0x35   :  { %426 = vmatprep.subr.bf16.mxu1 %v944_v34  ;;  %872 = vmatprep.subr.bf16.mxu0 %v970_v52  ;;  %v987_v52 = vld [vmem:[%s1322_s7 + $0x10] ss:$8 sps:$4 sm:$0xff]  }
  0x38   :  { %427 = vmatpush1.bf16.msra.mxu1 %v946_v35  ;;  %873 = vmatpush3.bf16.msra.mxu0 %v971_v53  ;;  %v990_v53 = vld [vmem:[%s1322_s7 + $0x20] ss:$8 sps:$4 sm:$0xff]  }
  0x39   :  { %428 = vmatprep.subr.bf16.mxu1 %v947_v36  ;;  %874 = vmatprep.subr.bf16.mxu0 %v972_v16 }
  0x3c   :  { %429 = vmatpush1.bf16.msra.mxu1 %v949_v37  ;;  %875 = vmatpush3.bf16.msra.mxu0 %v973_v17 }
  0x3d   :  { %430 = vmatprep.subr.bf16.mxu1 %v950_v38  ;;  %876 = vmatprep.subr.bf16.mxu0 %v974_v18 }
  0x40   :  { %431 = vmatpush1.bf16.msra.mxu1 %v952_v39  ;;  %877 = vmatpush3.bf16.msra.mxu0 %v975_v19 }
  0x41   :  { %432 = vmatprep.subr.bf16.mxu1 %v953_v40  ;;  %878 = vmatprep.subr.bf16.mxu0 %v976_v20 }
  0x44   :  { %433 = vmatpush1.bf16.msra.mxu1 %v955_v41  ;;  %879 = vmatpush3.bf16.msra.mxu0 %v977_v21 }
  0x45   :  { %434 = vmatprep.subr.bf16.mxu1 %v956_v42  ;;  %880 = vmatprep.subr.bf16.mxu0 %v978_v22 }
  0x48   :  { %435 = vmatpush1.bf16.msra.mxu1 %v958_v43  ;;  %881 = vmatpush3.bf16.msra.mxu0 %v979_v23 }
  0x49   :  { %436 = vmatprep.subr.bf16.mxu1 %v959_v44  ;;  %882 = vmatprep.subr.bf16.mxu0 %v980_v24 }
  0x4c   :  { %437 = vmatpush1.bf16.msra.mxu1 %v961_v45  ;;  %883 = vmatpush3.bf16.msra.mxu0 %v981_v25 }
  0x4d   :  { %438 = vmatprep.subr.bf16.mxu1 %v962_v46  ;;  %884 = vmatprep.subr.bf16.mxu0 %v982_v26 }
  0x50   :  { %439 = vmatpush1.bf16.msra.mxu1 %v964_v47  ;;  %885 = vmatpush3.bf16.msra.mxu0 %v983_v27 }
  0x51   :  { %440 = vmatprep.subr.bf16.mxu1 %v965_v48  ;;  %741 = vmatprep.subr.bf16.mxu0 %v986_v50 }
  0x54   :  { %441 = vmatpush1.bf16.msra.mxu1 %v967_v49  ;;  %v984_v49 = vld [vmem:[%s1322_s7] ss:$8 sps:$4 sm:$0xff]  }
 0x106   :  { %v187_v61 = vpop.f32.mrb[0].mxu0 }
 0x107   :  { %v188_v62 = vadd.f32 %v187_v61, %v66_v59  ;;  %v189_v63 = vpop.f32.mrb[1].mxu0 }
 0x108   :  { %v190_v1 = vadd.f32 %v189_v63, %v70_v60  ;;  %v191_v2 = vpop.f32.mrb[2].mxu0 }
 0x109   :  { %v196_v3 = vmul.f32 0.70710677, %v188_v62  ;;  %v192_v4 = vpop.f32.mrb[3].mxu0  ;;  %v194_v8 = vmul.f32 0.5, %v188_v62  ;;  %v996_v2 = vld [vmem:[%s1322_s7 + $0x40] ss:$8 sps:$4 sm:$0xff]  }
 0x10a   :  { %v197_v5 = vmul.f32 0.70710677, %v190_v1  ;;  %v195_v10 = vmul.f32 0.5, %v190_v1  ;;  %v998_v1 = vld [vmem:[%s1322_s7 + $0x44] ss:$8 sps:$4 sm:$0xff]  }
 0x10b   :  { %1008 = verf.f32 %v196_v3  ;;  %v999_v3 = vld [vmem:[%s1322_s7 + $0x50] ss:$8 sps:$4 sm:$0xff]   ;;  %v1001_v4 = vld [vmem:[%s1322_s7 + $0x54] ss:$8 sps:$4 sm:$0xff]  }
 0x10c   :  { %1010 = verf.f32 %v197_v5  ;;  %v1004_v5 = vld [vmem:[%s1322_s7 + $0x64] ss:$8 sps:$4 sm:$0xff]  }
 0x115   :  { %v1009_v6 = vpop.eup %1008 }
 0x116   :  { %v1011_v7 = vpop.eup %1010  ;;  %v200_v9 = vadd.f32 1.0, %v1009_v6  ;;  %v1002_v6 = vld [vmem:[%s1322_s7 + $0x60] ss:$8 sps:$4 sm:$0xff]  }
 0x117   :  { %v201_v11 = vadd.f32 1.0, %v1011_v7  ;;  %v1007_v7 = vld [vmem:[%s1322_s7 + $0x74] ss:$8 sps:$4 sm:$0xff]  }
 0x118   :  { %v202_v12 = vmul.f32 %v200_v9, %v194_v8  ;;  %v1005_v8 = vld [vmem:[%s1322_s7 + $0x70] ss:$8 sps:$4 sm:$0xff]  }
 0x119   :  { %v203_v13 = vmul.f32 %v201_v11, %v195_v10 }
 0x11a   :  { %v204_v15 = vpack.c.bf16 %v202_v12, %v202_v12 }
 0x11b   :  { %v205_v14 = vpack.c.bf16 %v203_v13, %v203_v13 }
 0x11d   :  { %442 = vmatprep.mubr.bf16.mxu1 %v205_v14 }
 0x11e   :  { %443 = vmatmul.mubr.bf16.vlgmr.msra.gmra.mrb[0].mxu1 %v204_v15 }
 0x1f1   :  { %v444_v31 = vpop.f32.mrb[0].mxu1 }
 0x1f2   :  { %v445_v32 = vadd.f32 %v444_v31, %v243_v29  ;;  %v446_v33 = vpop.f32.mrb[1].mxu1 }
 0x1f3   :  { %v447_v34 = vadd.f32 %v446_v33, %v247_v30  ;;  %v448_v35 = vpop.f32.mrb[2].mxu1 }
 0x1f4   :  { %v453_v36 = vmul.f32 0.70710677, %v445_v32  ;;  %v449_v37 = vpop.f32.mrb[3].mxu1  ;;  %v451_v41 = vmul.f32 0.5, %v445_v32 }
 0x1f5   :  { %v454_v38 = vmul.f32 0.70710677, %v447_v34  ;;  %v452_v43 = vmul.f32 0.5, %v447_v34 }
 0x1f6   :  { %1012 = verf.f32 %v453_v36 }
 0x1f7   :  { %1014 = verf.f32 %v454_v38 }
 0x200   :  { %v1013_v39 = vpop.eup %1012 }
 0x201   :  { %v1015_v40 = vpop.eup %1014  ;;  %v457_v42 = vadd.f32 1.0, %v1013_v39 }
 0x202   :  { %v458_v44 = vadd.f32 1.0, %v1015_v40 }
 0x203   :  { %v459_v45 = vmul.f32 %v457_v42, %v451_v41 }
 0x204   :  { %v460_v46 = vmul.f32 %v458_v44, %v452_v43 }
 0x205   :  { %v461_v48 = vpack.c.bf16 %v459_v45, %v459_v45 }
 0x206   :  { %v462_v47 = vpack.c.bf16 %v460_v46, %v460_v46 }
 0x208   :  { %630 = vmatprep.mubr.bf16.mxu0 %v462_v47 }
 0x209   :  { %631 = vmatmul.mubr.bf16.vlgmr.msra.gmra.mrb[4].mxu0 %v461_v48 }
 0x20a   :  { %773 = vmatprep.mubr.bf16.mxu0 %v1045_v0  ;;  %742 = vmatpush1.bf16.msra.mxu0 %v984_v49  ;;  %v992_v0 = vld [vmem:[%s1322_s7 + $0x24] ss:$8 sps:$4 sm:$0xff]  }
 0x20b   :  { %743 = vmatprep.subr.bf16.mxu0 %v989_v51 }
 0x20e   :  { %744 = vmatpush1.bf16.msra.mxu0 %v987_v52 }
 0x20f   :  { %745 = vmatprep.subr.bf16.mxu0 %v992_v0 }
 0x212   :  { %746 = vmatpush1.bf16.msra.mxu0 %v990_v53 }
 0x213   :  { %747 = vmatprep.subr.bf16.mxu0 %v995_v54 }
 0x216   :  { %748 = vmatpush1.bf16.msra.mxu0 %v993_v55 }
 0x217   :  { %749 = vmatprep.subr.bf16.mxu0 %v998_v1 }
 0x21a   :  { %750 = vmatpush1.bf16.msra.mxu0 %v996_v2 }
 0x21b   :  { %751 = vmatprep.subr.bf16.mxu0 %v1001_v4 }
 0x21e   :  { %752 = vmatpush1.bf16.msra.mxu0 %v999_v3 }
 0x21f   :  { %753 = vmatprep.subr.bf16.mxu0 %v1004_v5 }
 0x222   :  { %754 = vmatpush1.bf16.msra.mxu0 %v1002_v6 }
 0x223   :  { %755 = vmatprep.subr.bf16.mxu0 %v1007_v7 }
 0x226   :  { %756 = vmatpush1.bf16.msra.mxu0 %v1005_v8 }
 0x2dc   :  { %v886_v56 = vpop.f32.mrb[4].mxu0 }
 0x2dd   :  { %v887_v57 = vpop.f32.mrb[5].mxu0 }
 0x2de   :  { %v888_v59 = vadd.f32 %v887_v57, %v886_v56  ;;  %v889_v60 = vpop.f32.mrb[6].mxu0 }
 0x2df   :  { %v890_v61 = vpop.f32.mrb[7].mxu0 }
 0x2e0   :  { %v633_v62 = vadd.f32 %v888_v59, %v837_v58 }
 0x2e2   :  { %v638_v63 = vmul.f32 %v633_v62, %v633_v62 }
 0x2e4   :  { %639 = vadd.xlane.f32.xlu0 %v638_v63 }
 0x371   :  { %v640_v9 = vpop.xlane.xlu0 %639 }
 0x372   :  { %v641_v10 = vmax.f32 %v640_v9, 1e-24 }
 0x374   :  { %1016 = vrsqrt.f32 %v641_v10 }
 0x37e   :  { %v1017_v11 = vpop.eup %1016 }
 0x37f   :  { %v643_v12 = vmul.f32 %v1017_v11, %v633_v62 }
 0x381   :  { %v644_v13 = vpack.c.bf16 %v643_v12, %v643_v12 }
 0x383   :  { %774 = vmatmul.mubr.bf16.vlgmr.msra.gmra.mrb[8].mxu0 %v644_v13 }
 0x456   :  { %v775_v14 = vpop.f32.mrb[8].mxu0 }
 0x457   :  { %782 = vst [vmem:[%s1323_s8] sm:$0xff] %v775_v14  ;;  %v777_v15 = vpop.f32.mrb[9].mxu0 }
 0x458   :  { %783 = vst [vmem:[%s1323_s8 + $0x8] sm:$0xff] %v777_v15  ;;  %v779_v16 = vpop.f32.mrb[10].mxu0 }
 0x459   :  { %v780_v17 = vpop.f32.mrb[11].mxu0 }
 0x45a   :  { %788 = vsyncpa [#allocation3], 1 }

</bundles_post_ra>
